<compile_context>
chip_gen: v7x
topology: tpu7x:2x2x1
jax: 0.10.0
libtpu: 0.0.40
codegen_flags: <defaults>
</compile_context>

<pallas_src>
import jax
import jax.numpy as jnp
from jax.experimental import pallas as pl
from jax.experimental.pallas import tpu as pltpu


_ROW_TILE = 64      # max rows per block (bounds accumulator/temp vreg pressure)
_MAX_CHUNKS = 128   # max 128-lane chunks per grid step (bounds unrolled code size)
_MIN_STEPS = 4      # aim for at least this many pipelined steps per core


def _round_up(v, m):
    return -(-v // m) * m


def _cdiv(a, b):
    return -(-a // b)


def _tpu_flavor():
    """Returns (num_tensorcores, is_v7x_like). Conservative: only v7x-like
    parts get the 2-TensorCore split; anything else runs single-core."""
    try:
        kind = jax.devices()[0].device_kind.lower()
    except Exception:
        return 1, False
    is_v7 = "v7" in kind
    return (2 if is_v7 else 1), is_v7


def _sublane_pack(dtype):
    # rows per fully-packed vreg: f32 -> 8, bf16/f16 -> 16, int8/bool -> 32
    return 8 * max(1, 4 // jnp.dtype(dtype).itemsize)


def _pick_row_split(n, m, pack):
    """Smallest k with m % k == 0 and (n*k) % pack == 0 (full native sublane
    packing); falls back to an 8-row requirement, then k = 1."""
    for req in (pack, 8):
        for k in (1, 2, 4, 8, 16, 32):
            if m % k == 0 and (n * k) % req == 0:
                return k
    return 1


def _make_dice_kernel(*, ncores, spc, blocks, tm, mk):
    """Kernel closure over static tiling parameters.

    Grid (ncores > 1): (core, row_block, step)   -- step is the reduction axis
    Grid (ncores == 1): (row_block, step)
    Inputs:  (tr, tm) blocks of the (rows, mk) slabs (native dtype).
    Outputs: lane-dense (tr, 128) f32 partial sums, accumulated in place.
    """
    full_chunks = tm // 128
    rem = mk % tm                                   # valid lanes in last block (0 => full)
    irregular = (rem != 0) or (ncores * spc != blocks)

    def accum(x_ref, t_ref, tr, chunk_ids):
        # Elementwise VPU accumulation over lane-aligned 128-wide chunks read
        # straight from the block buffers; no cross-lane reduce per step.
        acc_i = jnp.zeros((tr, 128), jnp.float32)
        acc_c = jnp.zeros((tr, 128), jnp.float32)
        for q in chunk_ids:                          # static unroll
            xs = x_ref[:, pl.ds(q * 128, 128)].astype(jnp.float32)
            ts = t_ref[:, pl.ds(q * 128, 128)].astype(jnp.float32)
            acc_i = acc_i + xs * ts
            acc_c = acc_c + xs + ts
        return acc_i, acc_c

    def kernel(x_ref, t_ref, inter_ref, card_ref):
        tr = x_ref.shape[0]
        if ncores > 1:
            step = pl.program_id(2)
            gb = pl.program_id(0) * spc + step       # global lane-block index
        else:
            step = pl.program_id(1)
            gb = step

        @pl.when(step == 0)
        def _():
            inter_ref[...] = jnp.zeros_like(inter_ref)
            card_ref[...] = jnp.zeros_like(card_ref)

        if not irregular:
            ai, ac = accum(x_ref, t_ref, tr, range(full_chunks))
            inter_ref[...] += ai
            card_ref[...] += ac
        else:
            # Fast path: interior (fully valid) blocks, no masking.
            @pl.when(gb < blocks - 1)
            def _():
                ai, ac = accum(x_ref, t_ref, tr, range(full_chunks))
                inter_ref[...] += ai
                card_ref[...] += ac

            # Boundary block: statically-known partial chunk masked with a
            # lane iota (partial-block lanes beyond `mk` are unspecified).
            @pl.when(gb == blocks - 1)
            def _():
                valid = rem if rem else tm
                nf = valid // 128
                ai, ac = accum(x_ref, t_ref, tr, range(nf))
                tail = valid % 128
                if tail:
                    off = nf * 128
                    lane = jax.lax.broadcasted_iota(jnp.int32, (tr, 128), 1)
                    keep = lane < tail
                    xs = jnp.where(
                        keep, x_ref[:, pl.ds(off, 128)].astype(jnp.float32), 0.0)
                    ts = jnp.where(
                        keep, t_ref[:, pl.ds(off, 128)].astype(jnp.float32), 0.0)
                    ai = ai + xs * ts
                    ac = ac + xs + ts
                inter_ref[...] += ai
                card_ref[...] += ac
            # gb > blocks - 1 (redundant slot from the per-core split) adds nothing.

    return kernel


def _dice_sums(x2d, t2d):
    """Per-row sum(x*t) and sum(x+t) for (rows, mk) slabs. Returns two (rows,) f32."""
    rows, mk = x2d.shape
    ncores, is_v7 = _tpu_flavor()

    tr = rows if rows <= _ROW_TILE else _ROW_TILE
    row_blocks = _cdiv(rows, tr)

    isx = jnp.dtype(x2d.dtype).itemsize
    ist = jnp.dtype(t2d.dtype).itemsize

    work_budget = (24 << 20) if is_v7 else (48 << 20)     # double-buffered input budget
    vmem_cap = (48 << 20) if is_v7 else (96 << 20)        # stay under physical VMEM

    per_lane_bytes = 2 * tr * (isx + ist)                 # both inputs, double-buffered
    tm_budget = max(128, (work_budget // per_lane_bytes) // 128 * 128)
    per_core_lanes = _cdiv(mk, ncores)
    tm_steps = max(128, _round_up(_cdiv(per_core_lanes, _MIN_STEPS), 128))
    tm = min(tm_budget, tm_steps, _MAX_CHUNKS * 128)

    blocks = _cdiv(mk, tm)          # no padding of the inputs: last block is partial
    spc = _cdiv(blocks, ncores)     # steps per core

    vmem_limit = int(min(vmem_cap,
                         max(32 << 20, 2 * tr * tm * (isx + ist) + (8 << 20))))

    kernel = _make_dice_kernel(ncores=ncores, spc=spc, blocks=blocks, tm=tm, mk=mk)

    if ncores > 1:
        grid = (ncores, row_blocks, spc)
        in_map = lambda c, r, s: (r, jnp.minimum(c * spc + s, blocks - 1))
        out_map = lambda c, r, s: (c, r, 0)
        in_specs = [pl.BlockSpec((tr, tm), in_map),
                    pl.BlockSpec((tr, tm), in_map)]
        out_specs = [pl.BlockSpec((None, tr, 128), out_map),
                     pl.BlockSpec((None, tr, 128), out_map)]
        out_shape = (jax.ShapeDtypeStruct((ncores, rows, 128), jnp.float32),
                     jax.ShapeDtypeStruct((ncores, rows, 128), jnp.float32))
        core_sem = getattr(pltpu, "CORE_PARALLEL", "parallel")
        semantics = (core_sem, "parallel", "arbitrary")
    else:
        grid = (row_blocks, blocks)
        in_map = lambda r, s: (r, s)
        out_map = lambda r, s: (r, 0)
        in_specs = [pl.BlockSpec((tr, tm), in_map),
                    pl.BlockSpec((tr, tm), in_map)]
        out_specs = [pl.BlockSpec((tr, 128), out_map),
                     pl.BlockSpec((tr, 128), out_map)]
        out_shape = (jax.ShapeDtypeStruct((rows, 128), jnp.float32),
                     jax.ShapeDtypeStruct((rows, 128), jnp.float32))
        semantics = ("parallel", "arbitrary")

    inter, card = pl.pallas_call(
        kernel,
        out_shape=out_shape,
        grid_spec=pltpu.PrefetchScalarGridSpec(
            num_scalar_prefetch=0,
            grid=grid,
            in_specs=in_specs,
            out_specs=out_specs,
        ),
        compiler_params=pltpu.CompilerParams(
            dimension_semantics=semantics,
            vmem_limit_bytes=vmem_limit,
        ),
    )(x2d, t2d)

    if ncores > 1:
        inter = inter.sum(axis=0)       # combine per-core partials
        card = card.sum(axis=0)
    # Final tiny 128 -> 1 cross-lane reduce done here, keeping the kernel lane-dense.
    return inter.sum(axis=1), card.sum(axis=1)


def dice_loss_mean_percentile(x, target, percentile_val, eps=1e-07):
    """x, target: (N, C, D, H, W) arrays (any numeric dtype). Returns scalar loss."""
    n = x.shape[0]
    m = 1
    for s in x.shape[1:]:
        m *= s

    # Stream native dtypes; split rows so the sublane axis fills whole packed
    # vregs (8/16/32 rows for 32/16/8-bit) whenever possible.
    pack = min(_sublane_pack(x.dtype), _sublane_pack(target.dtype))
    k = _pick_row_split(n, m, pack)
    x2d = x.reshape(n * k, m // k)
    t2d = target.reshape(n * k, m // k)

    inter_rows, card_rows = _dice_sums(x2d, t2d)
    intersection = inter_rows.reshape(n, k).sum(axis=1)
    cardinality = card_rows.reshape(n, k).sum(axis=1)

    dice_score = 2.0 * intersection / (cardinality + eps)
    dice_sorted = jnp.sort(dice_score)          # ascending, matches python sorted()

    # percentile_val must be a static Python number (evaluated at trace time).
    # Match PyTorch list-indexing semantics: out-of-range index raises instead
    # of being silently clamped by a JAX gather.
    index = n - int(n * percentile_val / 100)
    if index >= n or index < -n:
        raise IndexError(
            f"percentile_val={percentile_val!r} gives index {index}, "
            f"out of range for batch size {n}")
    dice_at_index = dice_sorted[index]
    return 1.0 - dice_score.mean() + (1.0 - dice_at_index)


if __name__ == "__main__":
    key = jax.random.PRNGKey(0)
    kx, kt = jax.random.split(key)
    # (N, C, D, H, W) = (4, 3, 5, 6, 10) -> M = 900; exercises the row split
    # (rows = 8, mk = 450) and the in-kernel masked ragged tail (450 % 128 != 0).
    shape = (4, 3, 5, 6, 10)
    x = jax.random.uniform(kx, shape, dtype=jnp.float32)
    target = (jax.random.uniform(kt, shape, dtype=jnp.float32) > 0.5).astype(
        jnp.float32)

    percentile_val = 50  # index = 4 - int(4*50/100) = 2, valid in-bounds
    loss = dice_loss_mean_percentile(x, target, percentile_val)
    jax.block_until_ready(loss)

    # Reference check in plain JAX (same math, no Pallas).
    dims = (1, 2, 3, 4)
    inter_ref = jnp.sum(x * target, axis=dims)
    card_ref = jnp.sum(x + target, axis=dims)
    dice_ref = 2.0 * inter_ref / (card_ref + 1e-07)
    idx = shape[0] - int(shape[0] * percentile_val / 100)
    ref = 1.0 - dice_ref.mean() + (1.0 - jnp.sort(dice_ref)[idx])
    assert jnp.allclose(loss, ref, rtol=1e-5, atol=1e-5), (loss, ref)

    print("KERNEL_OK")
</pallas_src>

<mosaic_0001>
module attributes {stable_mosaic.version = 11 : i64} {
  func.func @kernel(%arg0: i32, %arg1: i32, %arg2: memref<8x128xf32, #tpu.memory_space<vmem>>, %arg3: memref<8x128xf32, #tpu.memory_space<vmem>>, %arg4: memref<8x128xf32, #tpu.memory_space<vmem>>, %arg5: memref<8x128xf32, #tpu.memory_space<vmem>>) attributes {dimension_semantics = [#tpu.dimension_semantics<parallel>, #tpu.dimension_semantics<arbitrary>], iteration_bounds = array<i64: 1, 4>, scalar_prefetch = 0 : i64, scratch_operands = 0 : i64, tpu.core_type = #tpu.core_type<tc>, window_params = [{transform_indices = @transform_0, window_bounds = array<i64: 8, 128>}, {transform_indices = @transform_1, window_bounds = array<i64: 8, 128>}, {transform_indices = @transform_2, window_bounds = array<i64: 8, 128>}, {transform_indices = @transform_3, window_bounds = array<i64: 8, 128>}]} {
    %c0_i32 = arith.constant 0 : i32
    %0 = arith.cmpi eq, %arg1, %c0_i32 : i32
    %1 = arith.extui %0 : i1 to i32
    %c0_i32_0 = arith.constant 0 : i32
    %2 = arith.cmpi ne, %1, %c0_i32_0 : i32
    scf.if %2 {
      %cst = arith.constant 0.000000e+00 : f32
      %9 = vector.broadcast %cst : f32 to vector<8x128xf32>
      %c0 = arith.constant 0 : index
      %c0_4 = arith.constant 0 : index
      %10 = vector.load %arg4[%c0, %c0_4] : memref<8x128xf32, #tpu.memory_space<vmem>>, vector<8x128xf32>
      tpu.vector_store %arg4[%c0, %c0_4], %9 {strides = array<i32>} : memref<8x128xf32, #tpu.memory_space<vmem>>, vector<8x128xf32>,
      %cst_5 = arith.constant 0.000000e+00 : f32
      %11 = vector.broadcast %cst_5 : f32 to vector<8x128xf32>
      %c0_6 = arith.constant 0 : index
      %c0_7 = arith.constant 0 : index
      %12 = vector.load %arg5[%c0_6, %c0_7] : memref<8x128xf32, #tpu.memory_space<vmem>>, vector<8x128xf32>
      tpu.vector_store %arg5[%c0_6, %c0_7], %11 {strides = array<i32>} : memref<8x128xf32, #tpu.memory_space<vmem>>, vector<8x128xf32>,
    } else {
    }
    %c3_i32 = arith.constant 3 : i32
    %3 = arith.cmpi slt, %arg1, %c3_i32 : i32
    %4 = arith.extui %3 : i1 to i32
    %c0_i32_1 = arith.constant 0 : i32
    %5 = arith.cmpi ne, %4, %c0_i32_1 : i32
    scf.if %5 {
      %cst = arith.constant 0.000000e+00 : f32
      %9 = vector.broadcast %cst : f32 to vector<8x128xf32>
      %cst_4 = arith.constant 0.000000e+00 : f32
      %10 = vector.broadcast %cst_4 : f32 to vector<8x128xf32>
      %c0 = arith.constant 0 : index
      %c0_5 = arith.constant 0 : index
      %11 = vector.load %arg2[%c0, %c0_5] : memref<8x128xf32, #tpu.memory_space<vmem>>, vector<8x128xf32>
      %c0_6 = arith.constant 0 : index
      %c0_7 = arith.constant 0 : index
      %12 = vector.load %arg3[%c0_6, %c0_7] : memref<8x128xf32, #tpu.memory_space<vmem>>, vector<8x128xf32>
      %13 = arith.mulf %11, %12 : vector<8x128xf32>
      %14 = arith.addf %9, %13 : vector<8x128xf32>
      %15 = arith.addf %10, %11 : vector<8x128xf32>
      %16 = arith.addf %15, %12 : vector<8x128xf32>
      %c0_8 = arith.constant 0 : index
      %c0_9 = arith.constant 0 : index
      %17 = vector.load %arg4[%c0_8, %c0_9] : memref<8x128xf32, #tpu.memory_space<vmem>>, vector<8x128xf32>
      %18 = arith.addf %17, %14 : vector<8x128xf32>
      %c0_10 = arith.constant 0 : index
      %c0_11 = arith.constant 0 : index
      %19 = vector.load %arg4[%c0_10, %c0_11] : memref<8x128xf32, #tpu.memory_space<vmem>>, vector<8x128xf32>
      tpu.vector_store %arg4[%c0_10, %c0_11], %18 {strides = array<i32>} : memref<8x128xf32, #tpu.memory_space<vmem>>, vector<8x128xf32>,
      %c0_12 = arith.constant 0 : index
      %c0_13 = arith.constant 0 : index
      %20 = vector.load %arg5[%c0_12, %c0_13] : memref<8x128xf32, #tpu.memory_space<vmem>>, vector<8x128xf32>
      %21 = arith.addf %20, %16 : vector<8x128xf32>
      %c0_14 = arith.constant 0 : index
      %c0_15 = arith.constant 0 : index
      %22 = vector.load %arg5[%c0_14, %c0_15] : memref<8x128xf32, #tpu.memory_space<vmem>>, vector<8x128xf32>
      tpu.vector_store %arg5[%c0_14, %c0_15], %21 {strides = array<i32>} : memref<8x128xf32, #tpu.memory_space<vmem>>, vector<8x128xf32>,
    } else {
    }
    %c3_i32_2 = arith.constant 3 : i32
    %6 = arith.cmpi eq, %arg1, %c3_i32_2 : i32
    %7 = arith.extui %6 : i1 to i32
    %c0_i32_3 = arith.constant 0 : i32
    %8 = arith.cmpi ne, %7, %c0_i32_3 : i32
    scf.if %8 {
      %cst = arith.constant 0.000000e+00 : f32
      %9 = vector.broadcast %cst : f32 to vector<8x128xf32>
      %cst_4 = arith.constant 0.000000e+00 : f32
      %10 = vector.broadcast %cst_4 : f32 to vector<8x128xf32>
      %11 = tpu.iota {dimensions = array<i32: 1>} : vector<8x128xi32>
      %c66_i32 = arith.constant 66 : i32
      %12 = vector.broadcast %c66_i32 : i32 to vector<8x128xi32>
      %13 = arith.cmpi slt, %11, %12 : vector<8x128xi32>
      %c0 = arith.constant 0 : index
      %c0_5 = arith.constant 0 : index
      %14 = vector.load %arg2[%c0, %c0_5] : memref<8x128xf32, #tpu.memory_space<vmem>>, vector<8x128xf32>
      %cst_6 = arith.constant 0.000000e+00 : f32
      %15 = vector.broadcast %cst_6 : f32 to vector<8x128xf32>
      %16 = arith.select %13, %14, %15 : vector<8x128xi1>, vector<8x128xf32>
      %c0_7 = arith.constant 0 : index
      %c0_8 = arith.constant 0 : index
      %17 = vector.load %arg3[%c0_7, %c0_8] : memref<8x128xf32, #tpu.memory_space<vmem>>, vector<8x128xf32>
      %cst_9 = arith.constant 0.000000e+00 : f32
      %18 = vector.broadcast %cst_9 : f32 to vector<8x128xf32>
      %19 = arith.select %13, %17, %18 : vector<8x128xi1>, vector<8x128xf32>
      %20 = arith.mulf %16, %19 : vector<8x128xf32>
      %21 = arith.addf %9, %20 : vector<8x128xf32>
      %22 = arith.addf %10, %16 : vector<8x128xf32>
      %23 = arith.addf %22, %19 : vector<8x128xf32>
      %c0_10 = arith.constant 0 : index
      %c0_11 = arith.constant 0 : index
      %24 = vector.load %arg4[%c0_10, %c0_11] : memref<8x128xf32, #tpu.memory_space<vmem>>, vector<8x128xf32>
      %25 = arith.addf %24, %21 : vector<8x128xf32>
      %c0_12 = arith.constant 0 : index
      %c0_13 = arith.constant 0 : index
      %26 = vector.load %arg4[%c0_12, %c0_13] : memref<8x128xf32, #tpu.memory_space<vmem>>, vector<8x128xf32>
      tpu.vector_store %arg4[%c0_12, %c0_13], %25 {strides = array<i32>} : memref<8x128xf32, #tpu.memory_space<vmem>>, vector<8x128xf32>,
      %c0_14 = arith.constant 0 : index
      %c0_15 = arith.constant 0 : index
      %27 = vector.load %arg5[%c0_14, %c0_15] : memref<8x128xf32, #tpu.memory_space<vmem>>, vector<8x128xf32>
      %28 = arith.addf %27, %23 : vector<8x128xf32>
      %c0_16 = arith.constant 0 : index
      %c0_17 = arith.constant 0 : index
      %29 = vector.load %arg5[%c0_16, %c0_17] : memref<8x128xf32, #tpu.memory_space<vmem>>, vector<8x128xf32>
      tpu.vector_store %arg5[%c0_16, %c0_17], %28 {strides = array<i32>} : memref<8x128xf32, #tpu.memory_space<vmem>>, vector<8x128xf32>,
    } else {
    }
    return
  }
  func.func @transform_0(%arg0: i32, %arg1: i32) -> (i32, i32) {
    %c0_i32 = arith.constant 0 : i32
    return %arg0, %arg1 : i32, i32
  }
  func.func @transform_1(%arg0: i32, %arg1: i32) -> (i32, i32) {
    %c0_i32 = arith.constant 0 : i32
    return %arg0, %arg1 : i32, i32
  }
  func.func @transform_2(%arg0: i32, %arg1: i32) -> (i32, i32) {
    %c0_i32 = arith.constant 0 : i32
    %c0_i32_0 = arith.constant 0 : i32
    return %arg0, %c0_i32 : i32, i32
  }
  func.func @transform_3(%arg0: i32, %arg1: i32) -> (i32, i32) {
    %c0_i32 = arith.constant 0 : i32
    %c0_i32_0 = arith.constant 0 : i32
    return %arg0, %c0_i32 : i32, i32
  }
}

</mosaic_0001>

<bundles_post_ra>
// kernel: tpu_custom_call.1
= control target key start
LH: loop header
LB: loop body
LE: loop exit
PB: predicated region body
PF: predicated region fallthrough
CT: control target
= control target key end

     0   :  { %9 = vsyncpa [#allocation3], 0  ;;  %s930_s0 = inlined_call_operand.hbm [shape: f32[8,450], index: 0, kind: input, shape index: {}]   ;;  %s931_s1 = inlined_call_operand.hbm [shape: f32[8,450], index: 1, kind: input, shape index: {}]   ;;  %s932_s2 = inlined_call_operand.hbm [shape: f32[8,128], index: 2, kind: output, shape index: {0}]   ;;  %s933_s3 = inlined_call_operand.hbm [shape: f32[8,128], index: 3, kind: output, shape index: {1}]  }
   0x1   :  { %11 = vsyncpa [#allocation3 + $0x1], 0 }
   0x2   :  { %12 = vsyncpa [#allocation6], 0 }
   0x3   :  { %14 = vsyncpa [#allocation6 + $0x1], 0 }
   0x4   :  { %15 = vsyncpa [#allocation4], 0 }
   0x5   :  { %16 = vsyncpa [#allocation9], 0  ;;  %s701_s12 = smov 0   ;;  %s703_s13 = smov 0  }
   0x6   :  { %s705_s14 = smov 0   ;;  %s707_s15 = smov 0  }
   0x7   :  { %s709_s16 = smov 0   ;;  %s711_s17 = smov 0  }
   0x8 LB: > { %s406_s18 = sadd.s32 4294967295, %s674_s17   ;;  %s31_s19 = sadd.s32 1, %s670_s16  ;;  %s674_s17 = sphi %s711_s17, %s22_s17   ;;  %s670_s16 = sphi %s709_s16, %s948_s16   ;;  %s666_s15 = sphi %s707_s15, %s947_s15   ;;  %s662_s14 = sphi %s705_s14, %s946_s14   ;;  %s658_s13 = sphi %s703_s13, %s945_s13   ;;  %s654_s12 = sphi %s701_s12, %s944_s12  }
   0x9   : > { %p32_p0 = scmp.ge.s32.totalorder %s31_s19, 4  ;;  %s43_s20 = sadd.s32 1, %s662_s14 }
   0xa   : > { %p50_p1 = scmp.ne.s32.totalorder %s662_s14, %s658_s13  ;;  %p51_p2 = scmp.eq.s32.totalorder %s674_s17, 0 }
   0xb   : > { %s950_s19 = smov (%p32_p0, %s31_s19), 0  ;;  %p56_p4 = scmp.ne.s32.totalorder %s658_s13, %s654_s12 }
   0xc   : > { %p737_p3 = por %p51_p2, %p50_p1  ;;  %s39_s22 = ssub.s32 %s670_s16, %s950_s19 }
   0xd   : > { %p57_p5 = scmp.eq.s32.totalorder %s406_s18, 0  ;;  %p41_p6 = scmp.eq.s32.totalorder %s39_s22, 0 }
   0xe   : > { %p444_p8 = scmp.lt.s32.totalorder %s674_s17, 4  ;;  %s755_s25 = sand.u32 1, %s662_s14  }
   0xf   : > { %p746_p7 = por %p57_p5, %p56_p4  ;;  %s410_s26 = sshll.u32 %s670_s16, 7 }
  0x10   : > { %s752_s24 = scalar_select %p41_p6, %s662_s14, %s43_s20  }
  0x11   : > { %s936_s23 = scalar_select %p746_p7, 1, 0 }
  0x12   : > { %s409_s27 = sshll.u32 %s755_s25, 3  ;;  %s764_s30 = scalar_lea.hbm %s930_s0, %s410_s26 }
  0x13   : > { %s164_s4 = scalar_lea.vmem [#allocation2], %s409_s27  ;;  %p770_p9 = pnand %p444_p8, %p737_p3 }
  0x14   : > { %s173_s5 = sshll.u32 %s164_s4, 4  ;;  %s161_s7 = scalar_lea.sflag [#allocation3], %s755_s25  ;;  %s774_s5 = int_to_ptr.vmem [resolvable:$true] %s173_s5 }
  0x15   : > { %s500_s8 = scalar_lea.hbm %s764_s30, 128  ;;  %p502_p13 = pneg %p770_p9 }
  0x16   : > { %p501_p12 = scmp.ne.s32.totalorder %s764_s30, %s500_s8  ;;  %s505_s11 = scalar_lea.hbm %s930_s0, 512 }
  0x17   : > { %p506_p2 = scmp.lt.u32.totalorder %s764_s30, %s930_s0  ;;  %p507_p3 = scmp.lt.u32.totalorder %s505_s11, %s500_s8 }
  0x18   : > { %p503_p0 = pnand %p502_p13, %p501_p12  ;;  %p509_p5 = scmp.lt.u32.totalorder %s500_s8, %s764_s30 }
  0x19   : > { %p508_p4 = por %p507_p3, %p506_p2 }
  0x1a   : > { %p504_p1 = pneg %p503_p0 }
  0x1b   : > { %p510_p6 = por %p509_p5, %p508_p4 }
  0x1d   : > { %p511_p8 = pnand %p510_p6, %p504_p1 }
  0x1f   : > { %514 = shalt.err (!%p511_p8)
}
  0x20   : > { %s515_s21 = scalar_lea.vmem %s774_s5, 128  ;;  %s676_s22 = smov [#allocation2]  }
  0x21   : > { %p516_p12 = scmp.ne.s32.totalorder %s774_s5, %s515_s21  ;;  %s520_s28 = sshll.u32 %s676_s22, 4  ;;  %s521_s28 = int_to_ptr.vmem [resolvable:$false] %s520_s28 }
  0x22   : > { %s522_s29 = scalar_lea.vmem %s521_s28, 256  ;;  %p523_p11 = scmp.lt.s32.totalorder %s774_s5, %s521_s28 }
  0x23   : > { %p518_p0 = pnand %p516_p12, %p502_p13  ;;  %p524_p2 = scmp.lt.s32.totalorder %s522_s29, %s515_s21 }
  0x25   : > { %p519_p10 = pneg %p518_p0  ;;  %p525_p3 = por %p524_p2, %p523_p11 }
  0x27   : > { %p526_p4 = pnand %p525_p3, %p519_p10 }
  0x29   : > { %529 = shalt.err (!%p526_p4)
}
  0x2a   : > { %440 = dma.hbm_to_vmem [thread:$0]  (!%p770_p9), %s764_s30, 128, %s774_s5, %s161_s7  }
  0x2b   : > { %p938_p1 = scmp.lt.s32.totalorder %s674_s17, 5  ;;  %p939_p5 = scmp.ge.s32.totalorder %s674_s17, 1 }
  0x2c   : > { %s817_s10 = scalar_lea.hbm %s931_s1, %s410_s26  ;;  %s184_s11 = scalar_lea.vmem [#allocation5], %s409_s27 }
  0x2d   : > { %p808_p6 = pnand %p939_p5, %p938_p1  ;;  %s193_s12 = sshll.u32 %s184_s11, 4  ;;  %s194_s12 = int_to_ptr.vmem [resolvable:$true] %s193_s12 }
  0x2e   : > { %s181_s30 = scalar_lea.sflag [#allocation6], %s755_s25  ;;  %s530_s5 = scalar_lea.hbm %s817_s10, 128 }
  0x2f   : > { %s940_s4 = scalar_select %p808_p6, 1, 0 }
  0x30   : > { %p531_p10 = scmp.ne.s32.totalorder %s817_s10, %s530_s5  ;;  %s535_s26 = scalar_lea.hbm %s931_s1, 512 }
  0x31   : > { %p536_p12 = scmp.lt.u32.totalorder %s817_s10, %s931_s1  ;;  %p537_p0 = scmp.lt.u32.totalorder %s535_s26, %s530_s5 }
  0x32   : > { %p533_p11 = pnand %p531_p10, %p502_p13  ;;  %p539_p3 = scmp.lt.u32.totalorder %s530_s5, %s817_s10 }
  0x33   : > { %p538_p2 = por %p537_p0, %p536_p12 }
  0x34   : > { %p534_p8 = pneg %p533_p11 }
  0x35   : > { %p540_p4 = por %p539_p3, %p538_p2 }
  0x37   : > { %p541_p1 = pnand %p540_p4, %p534_p8 }
  0x39   : > { %544 = shalt.err (!%p541_p1)
}
  0x3a   : > { %s545_s25 = scalar_lea.vmem %s194_s12, 128  ;;  %s677_s27 = smov [#allocation5]  }
  0x3b   : > { %p546_p5 = scmp.ne.s32.totalorder %s194_s12, %s545_s25  ;;  %s550_s28 = sshll.u32 %s677_s27, 4  ;;  %s551_s28 = int_to_ptr.vmem [resolvable:$false] %s550_s28 }
  0x3c   : > { %s552_s29 = scalar_lea.vmem %s551_s28, 256  ;;  %p553_p7 = scmp.lt.s32.totalorder %s194_s12, %s551_s28 }
  0x3d   : > { %p548_p10 = pnand %p546_p5, %p502_p13  ;;  %p554_p6 = scmp.lt.s32.totalorder %s552_s29, %s545_s25 }
  0x3f   : > { %p549_p11 = pneg %p548_p10  ;;  %p555_p0 = por %p554_p6, %p553_p7 }
  0x41   : > { %p556_p12 = pnand %p555_p0, %p549_p11 }
  0x43   : > { %559 = shalt.err (!%p556_p12)
}
  0x44   : > { %443 = dma.hbm_to_vmem [thread:$0]  (!%p770_p9), %s817_s10, 128, %s194_s12, %s181_s30  }
  0x45   : > { %p941_p8 = scmp.ne.s32.totalorder %s940_s4, 0 }
  0x46   : > { %s204_s8 = sand.u32 (!%p941_p8), 1, %s658_s13   ;;  %p942_p13 = scmp.ne.s32.totalorder (!%p941_p8), %s936_s23, 0 }
  0x47   : > { %202 = sbr.rel (%p941_p8) target bundleno = 159 (0x9f), region = 28  ;;  %s414_s9 = sshll.u32 (!%p941_p8), %s204_s8, 3 }
  0x48   : > { %s205_s11 = scalar_lea.sflag (!%p941_p8), [#allocation3], %s204_s8  ;;  %s208_s5 = scalar_lea.vmem (!%p941_p8), [#allocation2], %s414_s9 }
  0x4e   : > { %637 = dma.done.wait (%p942_p13), %s205_s11, 128  }
  0x4f   : > { %639 = vsyncadd (%p942_p13), %s205_s11, 4294967168  ;;  %s214_s7 = scalar_lea.sflag [#allocation6], %s204_s8  ;;  %s217_s20 = scalar_lea.vmem [#allocation5], %s414_s9 }
  0x50   : > { %641 = dma.done.wait (%p942_p13), %s214_s7, 128  }
  0x51   : > { %643 = vsyncadd (%p942_p13), %s214_s7, 4294967168  ;;  %p416_p7 = scmp.ne.s32.totalorder %s666_s15, 0 }
  0x52   : > { %v678_v0 = vmov (!%p416_p7), 0.0  }
  0x53   : > { %243 = sbr.rel (%p416_p7) target bundleno = 90 (0x5a), region = 40  ;;  %244 = vst [vmem:[#allocation7] sm:$0xff] (!%p416_p7), %v678_v0  ;;  %245 = vst [vmem:[#allocation8] sm:$0xff] (!%p416_p7), %v678_v0 }
  0x5a PF: > { %p417_p9 = scmp.ge.s32.totalorder %s666_s15, 3 }
  0x5b   : > { %v250_v1 = vld [vmem:[%s208_s5] sm:$0xff] (!%p417_p9)  ;;  %v251_v2 = vld [vmem:[%s217_s20] sm:$0xff] (!%p417_p9) }
  0x5c   : > { %249 = sbr.rel (%p417_p9) target bundleno = 99 (0x63), region = 44  ;;  %v256_v3 = vld [vmem:[#allocation7] sm:$0xff] (!%p417_p9)  ;;  %v252_v4 = vmul.f32 (!%p417_p9), %v251_v2, %v250_v1  ;;  %v255_v5 = vadd.f32 (!%p417_p9), %v251_v2, %v250_v1  ;;  %v259_v6 = vld [vmem:[#allocation8] sm:$0xff] (!%p417_p9) }
  0x5e   : > { %v257_v7 = vadd.f32 (!%p417_p9), %v256_v3, %v252_v4  ;;  %v260_v8 = vadd.f32 (!%p417_p9), %v259_v6, %v255_v5 }
  0x60   : > { %258 = vst [vmem:[#allocation7] sm:$0xff] (!%p417_p9), %v257_v7  ;;  %261 = vst [vmem:[#allocation8] sm:$0xff] (!%p417_p9), %v260_v8 }
  0x63 PF: > { %p418_p6 = scmp.ne.s32.totalorder %s666_s15, 3 }
  0x64   : > { %v266_v9 = vlaneseq (!%p418_p6)  ;;  %v269_v11 = vld [vmem:[%s208_s5] sm:$0xff] (!%p418_p6)  ;;  %v271_v12 = vld [vmem:[%s217_s20] sm:$0xff] (!%p418_p6) }
  0x65   : > { %265 = sbr.rel (%p418_p6) target bundleno = 111 (0x6f), region = 48 }
  0x66   : > { %v267_v10 = vand.u32 (!%p418_p6), 127, %v266_v9 }
  0x67   : > { %v277_v15 = vld [vmem:[#allocation7] sm:$0xff] (!%p418_p6)  ;;  %v280_v16 = vld [vmem:[#allocation8] sm:$0xff] (!%p418_p6) }
  0x68   : > { %vm268_vm0 = vcmp.lt.s32.totalorder (!%p418_p6), %v267_v10, 66 }
  0x69   : > { %v270_v13 = vsel (!%p418_p6), %vm268_vm0, %v269_v11, 0.0  ;;  %v272_v14 = vsel (!%p418_p6), %vm268_vm0, %v271_v12, 0.0 }
  0x6a   : > { %v273_v17 = vmul.f32 (!%p418_p6), %v272_v14, %v270_v13  ;;  %v276_v18 = vadd.f32 (!%p418_p6), %v272_v14, %v270_v13 }
  0x6c   : > { %v278_v19 = vadd.f32 %v277_v15, %v273_v17  ;;  %v281_v20 = vadd.f32 %v280_v16, %v276_v18 }
  0x6e   : > { %279 = vst [vmem:[#allocation7] sm:$0xff] %v278_v19  ;;  %282 = vst [vmem:[#allocation8] sm:$0xff] %v281_v20 }
  0x6f PF: > { %p857_p2 = scmp.eq.s32.totalorder %s406_s18, 3  ;;  %s679_s23 = smov [#allocation7]  }
  0x70   : > { %s292_s6 = sshll.u32 %s679_s23, 4  ;;  %s680_s4 = smov [#allocation8]   ;;  %s293_s6 = int_to_ptr.vmem [resolvable:$true] %s292_s6 }
  0x71   : > { %s305_s10 = sshll.u32 %s680_s4, 4  ;;  %s560_s12 = scalar_lea.vmem %s293_s6, 128  ;;  %s861_s10 = int_to_ptr.vmem [resolvable:$true] %s305_s10 }
  0x72   : > { %p561_p3 = scmp.ne.s32.totalorder %s293_s6, %s560_s12  ;;  %p567_p5 = scmp.lt.s32.totalorder %s293_s6, %s293_s6 }
  0x73   : > { %p568_p10 = scmp.lt.s32.totalorder %s560_s12, %s560_s12 }
  0x74   : > { %p562_p4 = pnand %p561_p3, %p857_p2 }
  0x75   : > { %p569_p11 = por %p568_p10, %p567_p5 }
  0x76   : > { %p563_p1 = pneg %p562_p4 }
  0x78   : > { %p570_p0 = pnand %p569_p11, %p563_p1 }
  0x7a   : > { %573 = shalt.err (!%p570_p0)
}
  0x7b   : > { %s574_s26 = scalar_lea.hbm %s932_s2, 128 }
  0x7c   : > { %p575_p12 = scmp.ne.s32.totalorder %s932_s2, %s574_s26  ;;  %p580_p7 = scmp.lt.u32.totalorder %s574_s26, %s932_s2 }
  0x7e   : > { %p576_p8 = pnand %p575_p12, %p857_p2 }
  0x80   : > { %p577_p13 = pneg %p576_p8 }
  0x82   : > { %p582_p9 = pnand %p580_p7, %p577_p13 }
  0x84   : > { %585 = shalt.err (!%p582_p9)
}
  0x85   : > { %430 = dma.vmem_to_hbm [thread:$0]  (%p857_p2), %s293_s6, 128, %s932_s2, [#allocation4]  }
  0x86   : > { %s586_s8 = scalar_lea.vmem %s861_s10, 128  ;;  %p593_p1 = scmp.lt.s32.totalorder %s861_s10, %s861_s10 }
  0x87   : > { %p587_p6 = scmp.ne.s32.totalorder %s861_s10, %s586_s8  ;;  %p594_p5 = scmp.lt.s32.totalorder %s586_s8, %s586_s8 }
  0x89   : > { %p588_p3 = pnand %p587_p6, %p857_p2  ;;  %p595_p10 = por %p594_p5, %p593_p1 }
  0x8b   : > { %p589_p4 = pneg %p588_p3 }
  0x8d   : > { %p596_p11 = pnand %p595_p10, %p589_p4 }
  0x8f   : > { %599 = shalt.err (!%p596_p11)
}
  0x90   : > { %s600_s5 = scalar_lea.hbm %s933_s3, 128 }
  0x91   : > { %p601_p0 = scmp.ne.s32.totalorder %s933_s3, %s600_s5  ;;  %p606_p13 = scmp.lt.u32.totalorder %s600_s5, %s933_s3 }
  0x93   : > { %p602_p12 = pnand %p601_p0, %p857_p2 }
  0x95   : > { %p603_p8 = pneg %p602_p12 }
  0x97   : > { %p608_p7 = pnand %p606_p13, %p603_p8 }
  0x99   : > { %611 = shalt.err (!%p608_p7)
}
  0x9a   : > { %432 = dma.vmem_to_hbm [thread:$0]  (%p857_p2), %s861_s10, 128, %s933_s3, [#allocation9]  }
  0x9b   : > { %645 = dma.done.wait (%p857_p2), [#allocation4], 128  }
  0x9c   : > { %647 = vsyncadd (%p857_p2), [#allocation4], 4294967168 }
  0x9d   : > { %649 = dma.done.wait (%p857_p2), [#allocation9], 128  }
  0x9e   : > { %651 = vsyncadd (%p857_p2), [#allocation9], 4294967168 }
  0x9f PF: > { %s22_s17 = sadd.s32 1, %s674_s17   ;;  %s944_s12 = smov %s658_s13 }
  0xa0   : > { %p19_p9 = scmp.ge.s32.totalorder %s22_s17, 6   ;;  %s945_s13 = smov %s662_s14 }
  0xa1   : > { %s946_s14 = smov %s752_s24  ;;  %s947_s15 = smov %s670_s16 }
  0xa2   : > { %s948_s16 = smov %s950_s19  ;;  %21 = sbr.rel (!%p19_p9) target bundleno = 8 (0x8), region = 100 }
  0xa9   :  { %322 = vsyncpa [#allocation3], 1 }
  0xaa   :  { %324 = vsyncpa [#allocation3 + $0x1], 1 }
  0xab   :  { %325 = vsyncpa [#allocation6], 1 }
  0xac   :  { %327 = vsyncpa [#allocation6 + $0x1], 1 }
  0xad   :  { %328 = vsyncpa [#allocation4], 1 }
  0xae   :  { %330 = vsyncpa [#allocation4 + $0x1], 1 }
  0xaf   :  { %331 = vsyncpa [#allocation9], 1 }

</bundles_post_ra>
